<compile_context>
chip_gen: v6e
topology: v6e:2x2x1
jax: 0.10.0
libtpu: 0.0.40
codegen_flags: <defaults>
</compile_context>

<pallas_src>
import functools
from typing import List

import jax
import jax.numpy as jnp
from jax.experimental import pallas as pl
from jax.experimental.pallas import tpu as pltpu

_LANES = 128
_SUBLANES = 8


def _round_up(x: int, m: int) -> int:
    return (x + m - 1) // m * m


def _munet_kernel(*refs, n_layers: int, out_pads, negative_slope: float, compute_dtype):
    """refs = (x_ref, w0, w1, ..., w_{L-1}, b_packed_ref, out_ref).

    One batch tile per grid step. Weights / packed biases are VMEM-resident.
    Hidden layers: LeakyReLU(negative_slope). Final layer: Tanh.
    Matmul operands in `compute_dtype` (bf16 by default), accumulation + elementwise in f32.
    """
    x_ref = refs[0]
    w_refs = refs[1:1 + n_layers]
    b_ref = refs[1 + n_layers]
    out_ref = refs[-1]

    h = x_ref[...].astype(jnp.float32)
    for i in range(n_layers):
        w = w_refs[i][...].astype(compute_dtype)
        # MXU matmul: narrow operands, f32 accumulation.
        acc = jnp.dot(h.astype(compute_dtype), w, preferred_element_type=jnp.float32)
        # Packed bias row for this layer (lane-aligned static slice), broadcast over batch.
        b = b_ref[i:i + 1, :out_pads[i]].astype(jnp.float32)
        h = acc + b
        if i < n_layers - 1:
            h = jnp.where(h > 0, h, negative_slope * h)   # LeakyReLU (f32, VPU)
        else:
            h = jnp.tanh(h)                               # Tanh (f32, EUP)
    out_ref[...] = h.astype(out_ref.dtype)


def munet_forward(s, weights, biases, *, batch_tile: int = 256,
                  compute_dtype=jnp.bfloat16, negative_slope: float = 0.01):
    """MuNet forward pass as one Pallas call.

    s:       (batch, dim_s) f32
    weights: list of (in_i, out_i) arrays  (y = x @ W + b, i.e. PyTorch W transposed)
    biases:  list of (out_i,) arrays
    """
    n_layers = len(weights)
    batch, dim_s = s.shape
    dim_out = weights[-1].shape[1]

    # ---- pad feature dims to 128-lane multiples (lane-dense matmuls + unmasked stores) ----
    in_dims = [w.shape[0] for w in weights]
    out_dims = [w.shape[1] for w in weights]
    in_pads = [_round_up(d, _LANES) for d in in_dims]
    out_pads = [_round_up(d, _LANES) for d in out_dims]
    max_out_pad = max(out_pads)

    # ---- batch tiling: sublane-aligned tile, padded batch a multiple of the tile ----
    # NOTE(v7x): VMEM is 64 MiB/TC (vs 128 MiB on v5e/v6e) -- shrink batch_tile if hidden
    # sizes grow large enough that resident weights + double-buffered tiles exceed it.
    tile_b = min(batch_tile, _round_up(batch, _SUBLANES))
    padded_batch = _round_up(batch, tile_b)
    n_tiles = padded_batch // tile_b

    out_dtype = s.dtype

    # ---- build padded operands (zero padding keeps the math exact) ----
    s_pad = jnp.zeros((padded_batch, in_pads[0]), s.dtype).at[:batch, :dim_s].set(s)

    w_ops = []
    for w, ip, op in zip(weights, in_pads, out_pads):
        wp = jnp.zeros((ip, op), compute_dtype)
        wp = wp.at[:w.shape[0], :w.shape[1]].set(w.astype(compute_dtype))
        w_ops.append(wp)

    # Pack all biases into a single 2-D f32 operand (rows padded to a sublane multiple).
    n_layers_pad = _round_up(n_layers, _SUBLANES)
    b_packed = jnp.zeros((n_layers_pad, max_out_pad), jnp.float32)
    for i, b in enumerate(biases):
        b_packed = b_packed.at[i, :b.shape[0]].set(b.astype(jnp.float32))

    # ---- BlockSpecs: x/out stream over the batch grid, weights/biases are resident ----
    in_specs = [pl.BlockSpec((tile_b, in_pads[0]), lambda i: (i, 0))]
    for wp in w_ops:
        in_specs.append(pl.BlockSpec(wp.shape, lambda i: (0, 0)))
    in_specs.append(pl.BlockSpec(b_packed.shape, lambda i: (0, 0)))

    out_spec = pl.BlockSpec((tile_b, out_pads[-1]), lambda i: (i, 0))
    out_shape = jax.ShapeDtypeStruct((padded_batch, out_pads[-1]), out_dtype)

    # ---- right-size the scoped-VMEM request (resident weights + double-buffered I/O) ----
    bytes_resident = sum(int(w.size) * w.dtype.itemsize for w in w_ops)
    bytes_resident += int(b_packed.size) * b_packed.dtype.itemsize
    bytes_streamed = 2 * tile_b * in_pads[0] * s_pad.dtype.itemsize
    bytes_streamed += 2 * tile_b * out_pads[-1] * jnp.dtype(out_dtype).itemsize
    vmem_limit = int(min(max(2 * (bytes_resident + bytes_streamed) + (1 << 20), 4 << 20),
                         64 << 20))

    kernel = functools.partial(
        _munet_kernel,
        n_layers=n_layers,
        out_pads=tuple(out_pads),
        negative_slope=negative_slope,
        compute_dtype=compute_dtype,
    )

    out_pad = pl.pallas_call(
        kernel,
        out_shape=out_shape,
        grid=(n_tiles,),
        in_specs=in_specs,
        out_specs=out_spec,
        compiler_params=pltpu.CompilerParams(
            dimension_semantics=("parallel",),   # batch axis -> both TCs on v7x
            vmem_limit_bytes=vmem_limit,
        ),
    )(s_pad, *w_ops, b_packed)

    # Strip batch / lane padding outside the kernel (keeps the in-kernel store lane-dense).
    return out_pad[:batch, :dim_out]


def init_munet_params(key, dim_s: int, dim_a_i: int, hidden_sizes: List[int]):
    """Deterministic init mirroring nn.Linear default (uniform +-1/sqrt(fan_in))."""
    sizes = [dim_s] + list(hidden_sizes) + [dim_a_i]
    weights, biases = [], []
    for i in range(len(sizes) - 1):
        fan_in, fan_out = sizes[i], sizes[i + 1]
        key, kw, kb = jax.random.split(key, 3)
        bound = 1.0 / jnp.sqrt(jnp.float32(fan_in))
        w = jax.random.uniform(kw, (fan_in, fan_out), jnp.float32, -bound, bound)
        b = jax.random.uniform(kb, (fan_out,), jnp.float32, -bound, bound)
        weights.append(w)
        biases.append(b)
    return weights, biases


def munet_reference(s, weights, biases):
    """Pure-JAX f32 reference for correctness check."""
    h = s
    n = len(weights)
    for i, (w, b) in enumerate(zip(weights, biases)):
        h = h @ w + b
        if i < n - 1:
            h = jnp.where(h > 0, h, 0.01 * h)
        else:
            h = jnp.tanh(h)
    return h


if __name__ == "__main__":
    # Small shapes consistent with MuNet(dim_s, dim_a_i, hidden_sizes)
    batch = 4
    dim_s = 16
    dim_a_i = 8
    hidden_sizes = [32, 32]

    key = jax.random.PRNGKey(0)
    key, k_s = jax.random.split(key)
    s = jax.random.normal(k_s, (batch, dim_s), dtype=jnp.float32)

    weights, biases = init_munet_params(key, dim_s, dim_a_i, hidden_sizes)
    ref = munet_reference(s, weights, biases)

    # f32 MXU operands: tight check against the f32 reference.
    out_f32 = jax.block_until_ready(
        munet_forward(s, weights, biases, compute_dtype=jnp.float32))
    assert out_f32.shape == (batch, dim_a_i)
    assert jnp.allclose(out_f32, ref, atol=1e-5, rtol=1e-5), "f32 Pallas output mismatch"

    # bf16 MXU operands (default fast path on v6e/v7x): loose tolerance vs f32 reference.
    out_bf16 = jax.block_until_ready(
        munet_forward(s, weights, biases, compute_dtype=jnp.bfloat16))
    assert out_bf16.shape == (batch, dim_a_i)
    assert jnp.allclose(out_bf16, ref, atol=5e-2, rtol=5e-2), "bf16 Pallas output mismatch"

    # TODO(synk): if many independent MuNet heads are evaluated per step, stack their
    # weights as (H, in, out) and add a "parallel" head grid axis to amortize launch/DMA.

    print("KERNEL_OK")
</pallas_src>

<mosaic_0001>
module attributes {stable_mosaic.version = 11 : i64} {
  func.func @_munet_kernel(%arg0: i32, %arg1: memref<8x128xf32, #tpu.memory_space<vmem>>, %arg2: memref<128x128xf32, #tpu.memory_space<vmem>>, %arg3: memref<128x128xf32, #tpu.memory_space<vmem>>, %arg4: memref<128x128xf32, #tpu.memory_space<vmem>>, %arg5: memref<8x128xf32, #tpu.memory_space<vmem>>, %arg6: memref<8x128xf32, #tpu.memory_space<vmem>>) attributes {dimension_semantics = [#tpu.dimension_semantics<parallel>], iteration_bounds = array<i64: 1>, scalar_prefetch = 0 : i64, scratch_operands = 0 : i64, tpu.core_type = #tpu.core_type<tc>, window_params = [{transform_indices = @transform_0, window_bounds = array<i64: 8, 128>}, {pipeline_mode = #tpu.pipeline_mode<synchronous>, transform_indices = @transform_1, window_bounds = array<i64: 128, 128>}, {pipeline_mode = #tpu.pipeline_mode<synchronous>, transform_indices = @transform_2, window_bounds = array<i64: 128, 128>}, {pipeline_mode = #tpu.pipeline_mode<synchronous>, transform_indices = @transform_3, window_bounds = array<i64: 128, 128>}, {pipeline_mode = #tpu.pipeline_mode<synchronous>, transform_indices = @transform_4, window_bounds = array<i64: 8, 128>}, {transform_indices = @transform_5, window_bounds = array<i64: 8, 128>}]} {
    %c0 = arith.constant 0 : index
    %c0_0 = arith.constant 0 : index
    %0 = vector.load %arg1[%c0, %c0_0] : memref<8x128xf32, #tpu.memory_space<vmem>>, vector<8x128xf32>
    %c0_1 = arith.constant 0 : index
    %c0_2 = arith.constant 0 : index
    %1 = vector.load %arg2[%c0_1, %c0_2] : memref<128x128xf32, #tpu.memory_space<vmem>>, vector<128x128xf32>
    %cst = arith.constant dense<0.000000e+00> : vector<8x128xf32>
    %2 = tpu.matmul %0, %1, %cst {dimension_numbers = #tpu.dot_dimension_numbers<[1], [0], [0], [1], [0, 0, 1, 1], [], []>} : vector<8x128xf32>, vector<128x128xf32>, vector<8x128xf32> -> vector<8x128xf32>
    %c0_3 = arith.constant 0 : index
    %c0_4 = arith.constant 0 : index
    %3 = vector.load %arg5[%c0_3, %c0_4] : memref<8x128xf32, #tpu.memory_space<vmem>>, vector<1x128xf32>
    %4 = vector.broadcast %3 : vector<1x128xf32> to vector<8x128xf32>
    %5 = arith.addf %2, %4 : vector<8x128xf32>
    %cst_5 = arith.constant 0.000000e+00 : f32
    %6 = vector.broadcast %cst_5 : f32 to vector<8x128xf32>
    %7 = arith.cmpf ogt, %5, %6 : vector<8x128xf32>
    %cst_6 = arith.constant 0.00999999977 : f32
    %8 = vector.broadcast %cst_6 : f32 to vector<8x128xf32>
    %9 = arith.mulf %8, %5 : vector<8x128xf32>
    %10 = arith.select %7, %5, %9 : vector<8x128xi1>, vector<8x128xf32>
    %c0_7 = arith.constant 0 : index
    %c0_8 = arith.constant 0 : index
    %11 = vector.load %arg3[%c0_7, %c0_8] : memref<128x128xf32, #tpu.memory_space<vmem>>, vector<128x128xf32>
    %cst_9 = arith.constant dense<0.000000e+00> : vector<8x128xf32>
    %12 = tpu.matmul %10, %11, %cst_9 {dimension_numbers = #tpu.dot_dimension_numbers<[1], [0], [0], [1], [0, 0, 1, 1], [], []>} : vector<8x128xf32>, vector<128x128xf32>, vector<8x128xf32> -> vector<8x128xf32>
    %c1 = arith.constant 1 : index
    %c0_10 = arith.constant 0 : index
    %13 = vector.load %arg5[%c1, %c0_10] : memref<8x128xf32, #tpu.memory_space<vmem>>, vector<1x128xf32>
    %14 = vector.broadcast %13 : vector<1x128xf32> to vector<8x128xf32>
    %15 = arith.addf %12, %14 : vector<8x128xf32>
    %cst_11 = arith.constant 0.000000e+00 : f32
    %16 = vector.broadcast %cst_11 : f32 to vector<8x128xf32>
    %17 = arith.cmpf ogt, %15, %16 : vector<8x128xf32>
    %cst_12 = arith.constant 0.00999999977 : f32
    %18 = vector.broadcast %cst_12 : f32 to vector<8x128xf32>
    %19 = arith.mulf %18, %15 : vector<8x128xf32>
    %20 = arith.select %17, %15, %19 : vector<8x128xi1>, vector<8x128xf32>
    %c0_13 = arith.constant 0 : index
    %c0_14 = arith.constant 0 : index
    %21 = vector.load %arg4[%c0_13, %c0_14] : memref<128x128xf32, #tpu.memory_space<vmem>>, vector<128x128xf32>
    %cst_15 = arith.constant dense<0.000000e+00> : vector<8x128xf32>
    %22 = tpu.matmul %20, %21, %cst_15 {dimension_numbers = #tpu.dot_dimension_numbers<[1], [0], [0], [1], [0, 0, 1, 1], [], []>} : vector<8x128xf32>, vector<128x128xf32>, vector<8x128xf32> -> vector<8x128xf32>
    %c2 = arith.constant 2 : index
    %c0_16 = arith.constant 0 : index
    %23 = vector.load %arg5[%c2, %c0_16] : memref<8x128xf32, #tpu.memory_space<vmem>>, vector<1x128xf32>
    %24 = vector.broadcast %23 : vector<1x128xf32> to vector<8x128xf32>
    %25 = arith.addf %22, %24 : vector<8x128xf32>
    %26 = math.tanh %25 : vector<8x128xf32>
    %c0_17 = arith.constant 0 : index
    %c0_18 = arith.constant 0 : index
    %27 = vector.load %arg6[%c0_17, %c0_18] : memref<8x128xf32, #tpu.memory_space<vmem>>, vector<8x128xf32>
    tpu.vector_store %arg6[%c0_17, %c0_18], %26 {strides = array<i32>} : memref<8x128xf32, #tpu.memory_space<vmem>>, vector<8x128xf32>,
    return
  }
  func.func @transform_0(%arg0: i32) -> (i32, i32) {
    %c0_i32 = arith.constant 0 : i32
    %c0_i32_0 = arith.constant 0 : i32
    return %arg0, %c0_i32 : i32, i32
  }
  func.func @transform_1(%arg0: i32) -> (i32, i32) {
    %c0_i32 = arith.constant 0 : i32
    %c0_i32_0 = arith.constant 0 : i32
    %c0_i32_1 = arith.constant 0 : i32
    return %c0_i32, %c0_i32_0 : i32, i32
  }
  func.func @transform_2(%arg0: i32) -> (i32, i32) {
    %c0_i32 = arith.constant 0 : i32
    %c0_i32_0 = arith.constant 0 : i32
    %c0_i32_1 = arith.constant 0 : i32
    return %c0_i32, %c0_i32_0 : i32, i32
  }
  func.func @transform_3(%arg0: i32) -> (i32, i32) {
    %c0_i32 = arith.constant 0 : i32
    %c0_i32_0 = arith.constant 0 : i32
    %c0_i32_1 = arith.constant 0 : i32
    return %c0_i32, %c0_i32_0 : i32, i32
  }
  func.func @transform_4(%arg0: i32) -> (i32, i32) {
    %c0_i32 = arith.constant 0 : i32
    %c0_i32_0 = arith.constant 0 : i32
    %c0_i32_1 = arith.constant 0 : i32
    return %c0_i32, %c0_i32_0 : i32, i32
  }
  func.func @transform_5(%arg0: i32) -> (i32, i32) {
    %c0_i32 = arith.constant 0 : i32
    %c0_i32_0 = arith.constant 0 : i32
    return %arg0, %c0_i32 : i32, i32
  }
}

</mosaic_0001>

<bundles_post_ra>
// kernel: tpu_custom_call.1
= control target key start
LH: loop header
LB: loop body
LE: loop exit
PB: predicated region body
PF: predicated region fallthrough
CT: control target
= control target key end

     0   :  { %10 = vsyncpa [#allocation3], 0  ;;  %s804_s0 = inlined_call_operand.hbm [shape: f32[8,128], index: 0, kind: input, shape index: {}]   ;;  %s805_s1 = inlined_call_operand.hbm [shape: f32[128,128], index: 1, kind: input, shape index: {}]   ;;  %s806_s2 = inlined_call_operand.hbm [shape: f32[128,128], index: 2, kind: input, shape index: {}]   ;;  %s807_s3 = inlined_call_operand.hbm [shape: f32[128,128], index: 3, kind: input, shape index: {}]   ;;  %s808_s4 = inlined_call_operand.hbm [shape: f32[8,128], index: 4, kind: input, shape index: {}]   ;;  %s809_s5 = inlined_call_operand.hbm [shape: f32[8,128], index: 5, kind: output, shape index: {}]  }
   0x1   :  { %11 = vsyncpa [#allocation6], 0 }
   0x2   :  { %12 = vsyncpa [#allocation9], 0 }
   0x3   :  { %13 = vsyncpa [#allocation4], 0  ;;  %s683_s18 = smov [#allocation5]  }
   0x4   :  { %s29_s19 = sshll.u32 %s683_s18, 4  ;;  %s30_s19 = int_to_ptr.vmem [resolvable:$true] %s29_s19 }
   0x5   :  { %s563_s20 = scalar_lea.vmem %s30_s19, 2048  ;;  %p568_p1 = scmp.lt.s32.totalorder %s30_s19, %s30_s19 }
   0x6   :  { %p564_p0 = scmp.ne.s32.totalorder %s30_s19, %s563_s20  ;;  %p569_p2 = scmp.lt.s32.totalorder %s563_s20, %s563_s20 }
   0x8   :  { %p570_p3 = por %p569_p2, %p568_p1 }
   0xa   :  { %p571_p4 = pnand %p570_p3, %p564_p0 }
   0xc   :  { %574 = shalt.err (!%p571_p4)
}
   0xd   :  { %s684_s21 = smov 128   ;;  %s685_s22 = smov 8  }
   0xe   :  { %35 = dma.hbm_to_vmem [thread:$0]  %s805_s1, 2048, %s30_s19, [#allocation6], %s684_s21, %s684_s21, %s685_s22  }
   0xf   :  { %s686_s25 = smov [#allocation8]   ;;  %s687_s27 = smov [#allocation2]  }
  0x10   :  { %s53_s26 = sshll.u32 %s686_s25, 4  ;;  %s20_s28 = sshll.u32 %s687_s27, 4  ;;  %s54_s26 = int_to_ptr.vmem [resolvable:$true] %s53_s26  ;;  %s21_s28 = int_to_ptr.vmem [resolvable:$true] %s20_s28 }
  0x11   :  { %s583_s29 = scalar_lea.vmem %s54_s26, 2048  ;;  %p588_p6 = scmp.lt.s32.totalorder %s54_s26, %s54_s26 }
  0x12   :  { %p584_p5 = scmp.ne.s32.totalorder %s54_s26, %s583_s29  ;;  %p589_p7 = scmp.lt.s32.totalorder %s583_s29, %s583_s29 }
  0x14   :  { %p590_p8 = por %p589_p7, %p588_p6 }
  0x16   :  { %p591_p9 = pnand %p590_p8, %p584_p5 }
  0x18   :  { %594 = shalt.err (!%p591_p9)
}
  0x19   :  { %59 = dma.hbm_to_vmem [thread:$0]  %s807_s3, 2048, %s54_s26, [#allocation9], %s684_s21, %s684_s21, %s685_s22  }
  0x1a   :  { %s603_s1 = scalar_lea.vmem %s21_s28, 128  ;;  %p608_p11 = scmp.lt.s32.totalorder %s21_s28, %s21_s28 }
  0x1b   :  { %p604_p10 = scmp.ne.s32.totalorder %s21_s28, %s603_s1  ;;  %p609_p12 = scmp.lt.s32.totalorder %s603_s1, %s603_s1 }
  0x1d   :  { %p610_p13 = por %p609_p12, %p608_p11 }
  0x1f   :  { %p611_p0 = pnand %p610_p13, %p604_p10 }
  0x21   :  { %614 = shalt.err (!%p611_p0)
}
  0x22   :  { %23 = dma.hbm_to_vmem [thread:$0]  %s804_s0, 128, %s21_s28, [#allocation3]  }
  0x23   :  { %s688_s9 = smov [#allocation7]   ;;  %s689_s11 = smov [#allocation10]  }
  0x24   :  { %s41_s10 = sshll.u32 %s688_s9, 4  ;;  %s66_s12 = sshll.u32 %s689_s11, 4  ;;  %s42_s10 = int_to_ptr.vmem [resolvable:$true] %s41_s10  ;;  %s67_s12 = int_to_ptr.vmem [resolvable:$true] %s66_s12 }
  0x25   :  { %s623_s13 = scalar_lea.vmem %s42_s10, 2048  ;;  %p628_p2 = scmp.lt.s32.totalorder %s42_s10, %s42_s10 }
  0x26   :  { %p624_p1 = scmp.ne.s32.totalorder %s42_s10, %s623_s13  ;;  %p629_p3 = scmp.lt.s32.totalorder %s623_s13, %s623_s13 }
  0x28   :  { %p630_p4 = por %p629_p3, %p628_p2 }
  0x2a   :  { %p631_p5 = pnand %p630_p4, %p624_p1 }
  0x2c   :  { %634 = shalt.err (!%p631_p5)
}
  0x2d   :  { %47 = dma.hbm_to_vmem [thread:$0]  %s806_s2, 2048, %s42_s10, [#allocation6], %s684_s21, %s684_s21, %s685_s22  }
  0x2e   :  { %s643_s0 = scalar_lea.vmem %s67_s12, 128  ;;  %p648_p7 = scmp.lt.s32.totalorder %s67_s12, %s67_s12 }
  0x2f   :  { %p644_p6 = scmp.ne.s32.totalorder %s67_s12, %s643_s0  ;;  %p649_p8 = scmp.lt.s32.totalorder %s643_s0, %s643_s0 }
  0x31   :  { %p650_p9 = por %p649_p8, %p648_p7 }
  0x33   :  { %p651_p10 = pnand %p650_p9, %p644_p6 }
  0x35   :  { %654 = shalt.err (!%p651_p10)
}
  0x36   :  { %69 = dma.hbm_to_vmem [thread:$0]  %s808_s4, 128, %s67_s12, [#allocation9]  }
  0x37   :  { %675 = dma.done.wait [#allocation3], 128  }
  0x38   :  { %676 = vsyncadd [#allocation3], 4294967168 }
  0x39   :  { %677 = dma.done.wait [#allocation6], 4096  }
  0x3a   :  { %678 = vsyncadd [#allocation6], 4294963200 }
  0x3b   :  { %679 = dma.done.wait [#allocation9], 2176  }
  0x3c   :  { %680 = vsyncadd [#allocation9], 4294965120  ;;  %v690_v0 = vmov 0.0   ;;  %vm691_vm0 = vmmov 0   ;;  %v101_v1 = vld [vmem:[#allocation5 + $0x78] sm:$0xff]  ;;  %v100_v2 = vld [vmem:[#allocation5 + $0x70] sm:$0xff] }
  0x3d   :  { %438 = vmatprep.subr.mxu0 %v690_v0  ;;  %470 = vmatprep.mubr.msk.f32.mxu0 %vm691_vm0, %v690_v0  ;;  %v99_v3 = vld [vmem:[#allocation5 + $0x68] sm:$0xff]  ;;  %v98_v4 = vld [vmem:[#allocation5 + $0x60] sm:$0xff]  ;;  %v195_v5 = vld [vmem:[#allocation7 + $0x78] sm:$0xff]  ;;  %s692_s2 = smov [#allocation11]  }
  0x3e   :  { %473 = vmatprep.subr.mxu1 %v690_v0  ;;  %505 = vmatprep.mubr.msk.f32.mxu1 %vm691_vm0, %v690_v0  ;;  %v97_v6 = vld [vmem:[#allocation5 + $0x58] sm:$0xff]  ;;  %v194_v7 = vld [vmem:[#allocation7 + $0x70] sm:$0xff]  ;;  %v193_v8 = vld [vmem:[#allocation7 + $0x68] sm:$0xff]  ;;  %s373_s4 = sshll.u32 %s692_s2, 4  ;;  %s374_s4 = int_to_ptr.vmem [resolvable:$true] %s373_s4 }
  0x3f   :  { %439 = vmatpush3.msra.mxu0 %v101_v1  ;;  %474 = vmatpush3.msra.mxu1 %v195_v5  ;;  %v96_v9 = vld [vmem:[#allocation5 + $0x50] sm:$0xff]  ;;  %v192_v10 = vld [vmem:[#allocation7 + $0x60] sm:$0xff]  ;;  %v95_v11 = vld [vmem:[#allocation5 + $0x48] sm:$0xff]  ;;  %s655_s17 = scalar_lea.vmem %s374_s4, 128  ;;  %p660_p12 = scmp.lt.s32.totalorder %s374_s4, %s374_s4 }
  0x40   :  { %440 = vmatprep.subr.mxu0 %v690_v0  ;;  %475 = vmatprep.subr.mxu1 %v690_v0  ;;  %v191_v12 = vld [vmem:[#allocation7 + $0x58] sm:$0xff]  ;;  %v94_v13 = vld [vmem:[#allocation5 + $0x40] sm:$0xff]  ;;  %v190_v14 = vld [vmem:[#allocation7 + $0x50] sm:$0xff]  ;;  %p656_p11 = scmp.ne.s32.totalorder %s374_s4, %s655_s17  ;;  %p661_p13 = scmp.lt.s32.totalorder %s655_s17, %s655_s17 }
  0x41   :  { %441 = vmatpush3.msra.mxu0 %v100_v2  ;;  %476 = vmatpush3.msra.mxu1 %v194_v7  ;;  %v93_v15 = vld [vmem:[#allocation5 + $0x38] sm:$0xff]  ;;  %v189_v16 = vld [vmem:[#allocation7 + $0x48] sm:$0xff]  ;;  %v92_v17 = vld [vmem:[#allocation5 + $0x30] sm:$0xff] }
  0x42   :  { %442 = vmatprep.subr.mxu0 %v690_v0  ;;  %477 = vmatprep.subr.mxu1 %v690_v0  ;;  %v188_v18 = vld [vmem:[#allocation7 + $0x40] sm:$0xff]  ;;  %v91_v19 = vld [vmem:[#allocation5 + $0x28] sm:$0xff]  ;;  %v187_v20 = vld [vmem:[#allocation7 + $0x38] sm:$0xff]  ;;  %p662_p0 = por %p661_p13, %p660_p12 }
  0x43   :  { %443 = vmatpush3.msra.mxu0 %v99_v3  ;;  %478 = vmatpush3.msra.mxu1 %v193_v8  ;;  %v90_v21 = vld [vmem:[#allocation5 + $0x20] sm:$0xff]  ;;  %v186_v22 = vld [vmem:[#allocation7 + $0x30] sm:$0xff]  ;;  %v89_v23 = vld [vmem:[#allocation5 + $0x18] sm:$0xff] }
  0x44   :  { %444 = vmatprep.subr.mxu0 %v690_v0  ;;  %479 = vmatprep.subr.mxu1 %v690_v0  ;;  %v185_v24 = vld [vmem:[#allocation7 + $0x28] sm:$0xff]  ;;  %v88_v25 = vld [vmem:[#allocation5 + $0x10] sm:$0xff]  ;;  %v184_v26 = vld [vmem:[#allocation7 + $0x20] sm:$0xff]  ;;  %p663_p1 = pnand %p662_p0, %p656_p11 }
  0x45   :  { %445 = vmatpush3.msra.mxu0 %v98_v4  ;;  %480 = vmatpush3.msra.mxu1 %v192_v10  ;;  %v87_v27 = vld [vmem:[#allocation5 + $0x8] sm:$0xff]  ;;  %v183_v28 = vld [vmem:[#allocation7 + $0x18] sm:$0xff]  ;;  %v86_v29 = vld [vmem:[#allocation5] sm:$0xff] }
  0x46   :  { %446 = vmatprep.subr.mxu0 %v690_v0  ;;  %481 = vmatprep.subr.mxu1 %v690_v0  ;;  %v85_v30 = vld [vmem:[#allocation2] sm:$0xff]  ;;  %v182_v31 = vld [vmem:[#allocation7 + $0x10] sm:$0xff]  ;;  %v181_v32 = vld [vmem:[#allocation7 + $0x8] sm:$0xff] }
  0x47   :  { %447 = vmatpush3.msra.mxu0 %v97_v6  ;;  %482 = vmatpush3.msra.mxu1 %v191_v12  ;;  %v180_v33 = vld [vmem:[#allocation7] sm:$0xff]  ;;  %v289_v34 = vld [vmem:[#allocation8 + $0x78] sm:$0xff]  ;;  %v288_v35 = vld [vmem:[#allocation8 + $0x70] sm:$0xff] }
  0x48   :  { %448 = vmatprep.subr.mxu0 %v690_v0  ;;  %483 = vmatprep.subr.mxu1 %v690_v0  ;;  %v287_v36 = vld [vmem:[#allocation8 + $0x68] sm:$0xff]  ;;  %v286_v37 = vld [vmem:[#allocation8 + $0x60] sm:$0xff]  ;;  %v285_v38 = vld [vmem:[#allocation8 + $0x58] sm:$0xff] }
  0x49   :  { %449 = vmatpush3.msra.mxu0 %v96_v9  ;;  %484 = vmatpush3.msra.mxu1 %v190_v14  ;;  %v284_v39 = vld [vmem:[#allocation8 + $0x50] sm:$0xff]  ;;  %v283_v40 = vld [vmem:[#allocation8 + $0x48] sm:$0xff]  ;;  %v282_v41 = vld [vmem:[#allocation8 + $0x40] sm:$0xff] }
  0x4a   :  { %450 = vmatprep.subr.mxu0 %v690_v0  ;;  %485 = vmatprep.subr.mxu1 %v690_v0  ;;  %v281_v42 = vld [vmem:[#allocation8 + $0x38] sm:$0xff]  ;;  %v280_v43 = vld [vmem:[#allocation8 + $0x30] sm:$0xff]  ;;  %v279_v44 = vld [vmem:[#allocation8 + $0x28] sm:$0xff] }
  0x4b   :  { %451 = vmatpush3.msra.mxu0 %v95_v11  ;;  %486 = vmatpush3.msra.mxu1 %v189_v16  ;;  %v278_v45 = vld [vmem:[#allocation8 + $0x20] sm:$0xff]  ;;  %v277_v46 = vld [vmem:[#allocation8 + $0x18] sm:$0xff]  ;;  %v276_v53 = vld [vmem:[#allocation8 + $0x10] sm:$0xff] }
  0x4c   :  { %452 = vmatprep.subr.mxu0 %v690_v0  ;;  %487 = vmatprep.subr.mxu1 %v690_v0  ;;  %v384_v47 = vld [vmem:[#allocation10] ss:$0 sm:$0xff]  ;;  %v275_v54 = vld [vmem:[#allocation8 + $0x8] sm:$0xff]  ;;  %v385_v56 = vld [vmem:[#allocation10 + $0x1] ss:$0 sm:$0xff] }
  0x4d   :  { %453 = vmatpush3.msra.mxu0 %v94_v13  ;;  %488 = vmatpush3.msra.mxu1 %v188_v18  ;;  %v274_v55 = vld [vmem:[#allocation8] sm:$0xff] }
  0x4e   :  { %454 = vmatprep.subr.mxu0 %v690_v0  ;;  %489 = vmatprep.subr.mxu1 %v690_v0  ;;  %v386_v62 = vld [vmem:[#allocation10 + $0x2] ss:$0 sm:$0xff] }
  0x4f   :  { %455 = vmatpush3.msra.mxu0 %v93_v15  ;;  %490 = vmatpush3.msra.mxu1 %v187_v20 }
  0x50   :  { %456 = vmatprep.subr.mxu0 %v690_v0  ;;  %491 = vmatprep.subr.mxu1 %v690_v0 }
  0x51   :  { %457 = vmatpush3.msra.mxu0 %v92_v17  ;;  %492 = vmatpush3.msra.mxu1 %v186_v22 }
  0x52   :  { %458 = vmatprep.subr.mxu0 %v690_v0  ;;  %493 = vmatprep.subr.mxu1 %v690_v0 }
  0x53   :  { %459 = vmatpush3.msra.mxu0 %v91_v19  ;;  %494 = vmatpush3.msra.mxu1 %v185_v24 }
  0x54   :  { %460 = vmatprep.subr.mxu0 %v690_v0  ;;  %495 = vmatprep.subr.mxu1 %v690_v0 }
  0x55   :  { %461 = vmatpush3.msra.mxu0 %v90_v21  ;;  %496 = vmatpush3.msra.mxu1 %v184_v26 }
  0x56   :  { %462 = vmatprep.subr.mxu0 %v690_v0  ;;  %497 = vmatprep.subr.mxu1 %v690_v0 }
  0x57   :  { %463 = vmatpush3.msra.mxu0 %v89_v23  ;;  %498 = vmatpush3.msra.mxu1 %v183_v28 }
  0x58   :  { %464 = vmatprep.subr.mxu0 %v690_v0  ;;  %499 = vmatprep.subr.mxu1 %v690_v0 }
  0x59   :  { %465 = vmatpush3.msra.mxu0 %v88_v25  ;;  %500 = vmatpush3.msra.mxu1 %v182_v31 }
  0x5a   :  { %466 = vmatprep.subr.mxu0 %v690_v0  ;;  %501 = vmatprep.subr.mxu1 %v690_v0 }
  0x5b   :  { %467 = vmatpush3.msra.mxu0 %v87_v27  ;;  %502 = vmatpush3.msra.mxu1 %v181_v32 }
  0x5c   :  { %468 = vmatprep.subr.mxu0 %v690_v0  ;;  %503 = vmatprep.subr.mxu1 %v690_v0 }
  0x5d   :  { %469 = vmatpush3.msra.mxu0 %v86_v29  ;;  %504 = vmatpush3.msra.mxu1 %v180_v33 }
  0x5e   :  { %471 = vmatmul.mubr.f32.vlgmr.msra.gmra.mxu0 %v85_v30  ;;  %508 = vmatprep.subr.mxu0 %v690_v0 }
  0x5f   :  { %540 = vmatprep.mubr.msk.f32.mxu0 %vm691_vm0, %v690_v0  ;;  %509 = vmatpush3.msra.mxu0 %v289_v34 }
  0x60   :  { %510 = vmatprep.subr.mxu0 %v690_v0 }
  0x61   :  { %511 = vmatpush3.msra.mxu0 %v288_v35 }
  0x62   :  { %512 = vmatprep.subr.mxu0 %v690_v0 }
  0x63   :  { %513 = vmatpush3.msra.mxu0 %v287_v36 }
  0x64   :  { %514 = vmatprep.subr.mxu0 %v690_v0 }
  0x65   :  { %515 = vmatpush3.msra.mxu0 %v286_v37 }
  0x66   :  { %516 = vmatprep.subr.mxu0 %v690_v0 }
  0x67   :  { %517 = vmatpush3.msra.mxu0 %v285_v38 }
  0x68   :  { %518 = vmatprep.subr.mxu0 %v690_v0 }
  0x69   :  { %519 = vmatpush3.msra.mxu0 %v284_v39 }
  0x6a   :  { %520 = vmatprep.subr.mxu0 %v690_v0 }
  0x6b   :  { %521 = vmatpush3.msra.mxu0 %v283_v40 }
  0x6c   :  { %522 = vmatprep.subr.mxu0 %v690_v0 }
  0x6d   :  { %523 = vmatpush3.msra.mxu0 %v282_v41 }
  0x6e   :  { %524 = vmatprep.subr.mxu0 %v690_v0 }
  0x6f   :  { %525 = vmatpush3.msra.mxu0 %v281_v42 }
  0x70   :  { %526 = vmatprep.subr.mxu0 %v690_v0 }
  0x71   :  { %527 = vmatpush3.msra.mxu0 %v280_v43 }
  0x72   :  { %528 = vmatprep.subr.mxu0 %v690_v0 }
  0x73   :  { %529 = vmatpush3.msra.mxu0 %v279_v44 }
  0x74   :  { %530 = vmatprep.subr.mxu0 %v690_v0 }
  0x75   :  { %531 = vmatpush3.msra.mxu0 %v278_v45 }
  0x76   :  { %532 = vmatprep.subr.mxu0 %v690_v0 }
  0x77   :  { %533 = vmatpush3.msra.mxu0 %v277_v46 }
  0x78   :  { %534 = vmatprep.subr.mxu0 %v690_v0 }
  0x79   :  { %535 = vmatpush3.msra.mxu0 %v276_v53 }
  0x7a   :  { %536 = vmatprep.subr.mxu0 %v690_v0 }
  0x7b   :  { %537 = vmatpush3.msra.mxu0 %v275_v54 }
  0x7c   :  { %538 = vmatprep.subr.mxu0 %v690_v0 }
  0x7d   :  { %539 = vmatpush3.msra.mxu0 %v274_v55 }
 0x11e   :  { %v173_v48 = vpop.f32.mrf.mxu0 }
 0x11f   :  { %v174_v49 = vadd.f32 %v384_v47, %v173_v48 }
 0x120   :  { %v472_v50 = vpop.f32.mrf.mxu0 }
 0x121   :  { %v178_v51 = vmul.f32 0.01, %v174_v49  ;;  %vm177_vm1 = vcmp.gt.f32.partialorder %v174_v49, 0.0 }
 0x123   :  { %v179_v52 = vsel %vm177_vm1, %v174_v49, %v178_v51 }
 0x124   :  { %506 = vmatmul.mubr.f32.vlgmr.msra.gmra.mxu1 %v179_v52 }
 0x1e4   :  { %v267_v57 = vpop.f32.mrf.mxu1 }
 0x1e5   :  { %v268_v58 = vadd.f32 %v385_v56, %v267_v57 }
 0x1e6   :  { %v507_v59 = vpop.f32.mrf.mxu1 }
 0x1e7   :  { %vm271_vm2 = vcmp.gt.f32.partialorder %v268_v58, 0.0  ;;  %v272_v60 = vmul.f32 0.01, %v268_v58 }
 0x1e9   :  { %v273_v61 = vsel %vm271_vm2, %v268_v58, %v272_v60 }
 0x1ea   :  { %541 = vmatmul.mubr.f32.vlgmr.msra.gmra.mxu0 %v273_v61 }
 0x2aa   :  { %v361_v63 = vpop.f32.mrf.mxu0 }
 0x2ab   :  { %v362_v1 = vadd.f32 %v386_v62, %v361_v63 }
 0x2ac   :  { %v542_v2 = vpop.f32.mrf.mxu0 }
 0x2ad   :  { %553 = vtanh.f32 %v362_v1 }
 0x2ba   :  { %v554_v3 = vpop.eup %553 }
 0x2bb   :  { %366 = vst [vmem:[#allocation11] sm:$0xff] %v554_v3 }
 0x2bc   :  { %666 = shalt.err (!%p663_p1)
}
 0x2bd   :  { %376 = dma.vmem_to_hbm [thread:$0]  %s374_s4, 128, %s809_s5, [#allocation4]  }
 0x2be   :  { %681 = dma.done.wait [#allocation4], 128  }
 0x2bf   :  { %682 = vsyncadd [#allocation4], 4294967168 }
 0x2c0   :  { %380 = vsyncpa [#allocation3], 1 }
 0x2c1   :  { %381 = vsyncpa [#allocation6], 1 }
 0x2c2   :  { %382 = vsyncpa [#allocation9], 1 }
 0x2c3   :  { %383 = vsyncpa [#allocation4], 1 }

</bundles_post_ra>
